<compile_context>
chip_gen: v7x
topology: tpu7x:2x2x1
jax: 0.10.0
libtpu: 0.0.40
codegen_flags: <defaults>
</compile_context>

<pallas_src>
import jax
import jax.numpy as jnp
import numpy as np
from jax.experimental import pallas as pl
from jax.experimental.pallas import tpu as pltpu

_VMEM = pltpu.MemorySpace.VMEM


# ----------------------------------------------------------------------------
# Pallas kernel: one full GRU layer (all timesteps) in a single invocation.
#   x_ref    : (T*B, In)   input sequence, flattened over (time, batch)
#   h0_ref   : (B, H)      initial hidden state
#   w_ih_ref : (In, 3H)    fused input->gates weights, gate order (r, z, n)
#   b_ih_ref : (1, 3H)
#   w_hh_ref : (H, 3H)     fused hidden->gates weights
#   b_hh_ref : (1, 3H)
#   out_ref  : (T*B, H)    hidden state for every timestep (r_out, flattened)
# For long sequences, tile T with an "arbitrary" grid axis instead of the
# fully-unrolled loop below; at T=8 whole-sequence residency is optimal.
# ----------------------------------------------------------------------------
def _gru_layer_kernel(x_ref, h0_ref, w_ih_ref, b_ih_ref, w_hh_ref, b_hh_ref,
                      out_ref):
    B, H = h0_ref.shape
    T = x_ref.shape[0] // B

    # Hoisted input projection: a single MXU matmul over the whole sequence.
    gx = jnp.dot(x_ref[...].astype(jnp.float32), w_ih_ref[...],
                 preferred_element_type=jnp.float32) + b_ih_ref[...]

    w_hh = w_hh_ref[...]
    b_hh = b_hh_ref[...]
    h = h0_ref[...].astype(jnp.float32)

    # Sequential recurrence: only one (B,H)x(H,3H) dot per step remains.
    # T is a static Python int -> fully unrolled, all slices are static.
    for t in range(T):
        gx_t = gx[t * B:(t + 1) * B, :]                         # (B, 3H)
        gh = jnp.dot(h, w_hh, preferred_element_type=jnp.float32) + b_hh
        r = jax.nn.sigmoid(gx_t[:, :H] + gh[:, :H])
        z = jax.nn.sigmoid(gx_t[:, H:2 * H] + gh[:, H:2 * H])
        n = jnp.tanh(gx_t[:, 2 * H:] + r * gh[:, 2 * H:])       # PyTorch GRU
        h = (1.0 - z) * n + z * h
        out_ref[t * B:(t + 1) * B, :] = h.astype(out_ref.dtype)


# ----------------------------------------------------------------------------
# Pallas kernel: Linear(H -> 1) applied to every (t, b) position.
#   x_ref : (T*B, H),  w_ref : (1, H),  b_ref : (1, 1),  o_ref : (T*B, 1)
# ----------------------------------------------------------------------------
def _linear_head_kernel(x_ref, w_ref, b_ref, o_ref):
    x = x_ref[...].astype(jnp.float32)
    w = w_ref[...].astype(jnp.float32)
    y = jnp.sum(x * w, axis=-1, keepdims=True) + b_ref[...]
    o_ref[...] = y.astype(o_ref.dtype)


# ----------------------------------------------------------------------------
# Wrappers
# ----------------------------------------------------------------------------
def gru_layer_pallas(x, h0, prepped_layer):
    """One GRU layer. x: (T, B, In), h0: (B, H). Returns (r_out, h_last)."""
    w_ih, b_ih, w_hh, b_hh = prepped_layer
    T, B, In = x.shape
    H = w_hh.shape[0]

    out2 = pl.pallas_call(
        _gru_layer_kernel,
        out_shape=jax.ShapeDtypeStruct((T * B, H), x.dtype),
        in_specs=[pl.BlockSpec(memory_space=_VMEM)] * 6,
        out_specs=pl.BlockSpec(memory_space=_VMEM),
    )(x.reshape(T * B, In), h0, w_ih, b_ih, w_hh, b_hh)

    r_out = out2.reshape(T, B, H)
    return r_out, r_out[-1]          # h_n recovered from the last timestep


def linear_head_pallas(x, w_out, b_out):
    """Linear(H, 1) over a (T, B, H) sequence -> (T, B, 1)."""
    T, B, H = x.shape
    y = pl.pallas_call(
        _linear_head_kernel,
        out_shape=jax.ShapeDtypeStruct((T * B, 1), x.dtype),
        in_specs=[pl.BlockSpec(memory_space=_VMEM)] * 3,
        out_specs=pl.BlockSpec(memory_space=_VMEM),
    )(x.reshape(T * B, H), w_out, b_out.reshape(1, 1))
    return y.reshape(T, B, 1)


def seq2seq_forward(x, target, batch_size, enc_prepped, dec_prepped, head):
    """Equivalent of Seq2seq.forward(x, target, batch_size)."""
    del target, batch_size  # only sized a torch.zeros that forward overwrites
    T, B, _ = x.shape
    H = enc_prepped[0][2].shape[0]

    # Encoder: multi-layer GRU, zero initial state.
    inp = x
    h_list = []
    for layer in enc_prepped:
        inp, h_last = gru_layer_pallas(inp, jnp.zeros((B, H), x.dtype), layer)
        h_list.append(h_last)
    h_n = jnp.stack(h_list, axis=0)                  # (num_layers, B, H)

    # Decoder: multi-layer GRU on x, seeded with the encoder's h_n per layer.
    dec = x
    for l, layer in enumerate(dec_prepped):
        dec, _ = gru_layer_pallas(dec, h_n[l], layer)

    # Output head: Linear(H, 1) -> (T, B, 1).
    w_out, b_out = head
    return linear_head_pallas(dec, w_out, b_out)


# ----------------------------------------------------------------------------
# Parameters: PyTorch-style init, then a one-time prep (split/transpose/fuse)
# so no per-call weight reshuffling happens in the forward path.
# ----------------------------------------------------------------------------
def init_gru_params(key, input_size, hidden_size, num_layers):
    params = []
    k = 1.0 / float(np.sqrt(hidden_size))
    for layer in range(num_layers):
        in_sz = input_size if layer == 0 else hidden_size
        key, k0, k1, k2, k3 = jax.random.split(key, 5)
        w_ih = jax.random.uniform(k0, (3 * hidden_size, in_sz), jnp.float32, -k, k)
        w_hh = jax.random.uniform(k1, (3 * hidden_size, hidden_size), jnp.float32, -k, k)
        b_ih = jax.random.uniform(k2, (3 * hidden_size,), jnp.float32, -k, k)
        b_hh = jax.random.uniform(k3, (3 * hidden_size,), jnp.float32, -k, k)
        params.append((w_ih, w_hh, b_ih, b_hh))
    return key, params


def prepare_gru_params(raw_params):
    """(3H,In)/(3H,H) packed weights -> fused (In,3H)/(H,3H) + (1,3H) biases."""
    prepped = []
    for (w_ih, w_hh, b_ih, b_hh) in raw_params:
        H3 = w_hh.shape[0]
        prepped.append((jnp.asarray(w_ih.T),            # (In, 3H)
                        b_ih.reshape(1, H3),            # (1, 3H)
                        jnp.asarray(w_hh.T),            # (H, 3H)
                        b_hh.reshape(1, H3)))           # (1, 3H)
    return prepped


# ----------------------------------------------------------------------------
# Pure-JAX reference (lax.scan) for correctness checking.
# ----------------------------------------------------------------------------
def _gru_layer_ref(x, h0, w_ih, w_hh, b_ih, b_hh):
    H = w_hh.shape[1]

    def step(h, x_t):
        gx = x_t @ w_ih.T + b_ih
        gh = h @ w_hh.T + b_hh
        r = jax.nn.sigmoid(gx[:, :H] + gh[:, :H])
        z = jax.nn.sigmoid(gx[:, H:2 * H] + gh[:, H:2 * H])
        n = jnp.tanh(gx[:, 2 * H:] + r * gh[:, 2 * H:])
        h_new = (1.0 - z) * n + z * h
        return h_new, h_new

    h_last, outs = jax.lax.scan(step, h0, x)
    return outs, h_last


def seq2seq_ref(x, enc_params, dec_params, head):
    T, B, _ = x.shape
    H = enc_params[0][1].shape[1]
    inp = x
    h_list = []
    for (w_ih, w_hh, b_ih, b_hh) in enc_params:
        inp, h_last = _gru_layer_ref(inp, jnp.zeros((B, H), jnp.float32),
                                     w_ih, w_hh, b_ih, b_hh)
        h_list.append(h_last)
    h_n = jnp.stack(h_list, axis=0)
    dec = x
    for l, (w_ih, w_hh, b_ih, b_hh) in enumerate(dec_params):
        dec, _ = _gru_layer_ref(dec, h_n[l], w_ih, w_hh, b_ih, b_hh)
    w_out, b_out = head
    return dec @ w_out.T + b_out


if __name__ == "__main__":
    SEQ, BATCH, INPUT_SIZE, HIDDEN_SIZE, NUM_LAYERS = 8, 2, 16, 32, 2

    key = jax.random.PRNGKey(0)
    key, xk, tk = jax.random.split(key, 3)
    x = jax.random.normal(xk, (SEQ, BATCH, INPUT_SIZE), jnp.float32)
    target = jax.random.normal(tk, (SEQ, BATCH, 1), jnp.float32)  # unused, as in torch

    key, enc_raw = init_gru_params(key, INPUT_SIZE, HIDDEN_SIZE, NUM_LAYERS)
    key, dec_raw = init_gru_params(key, INPUT_SIZE, HIDDEN_SIZE, NUM_LAYERS)
    key, kw, kb = jax.random.split(key, 3)
    kscale = 1.0 / float(np.sqrt(HIDDEN_SIZE))
    w_out = jax.random.uniform(kw, (1, HIDDEN_SIZE), jnp.float32, -kscale, kscale)
    b_out = jax.random.uniform(kb, (1,), jnp.float32, -kscale, kscale)
    head = (w_out, b_out)

    # One-time weight prep (outside the forward path).
    enc_prepped = prepare_gru_params(enc_raw)
    dec_prepped = prepare_gru_params(dec_raw)

    out = seq2seq_forward(x, target, BATCH, enc_prepped, dec_prepped, head)
    out = jax.block_until_ready(out)

    out_ref = seq2seq_ref(x, enc_raw, dec_raw, head)
    np.testing.assert_allclose(np.asarray(out), np.asarray(out_ref),
                               atol=1e-4, rtol=1e-4)
    assert out.shape == (SEQ, BATCH, 1)

    print("KERNEL_OK")
</pallas_src>

<mosaic_0001>
module attributes {stable_mosaic.version = 11 : i64} {
  func.func @_gru_layer_kernel(%arg0: memref<16x16xf32, #tpu.memory_space<vmem>>, %arg1: memref<2x32xf32, #tpu.memory_space<vmem>>, %arg2: memref<16x96xf32, #tpu.memory_space<vmem>>, %arg3: memref<1x96xf32, #tpu.memory_space<vmem>>, %arg4: memref<32x96xf32, #tpu.memory_space<vmem>>, %arg5: memref<1x96xf32, #tpu.memory_space<vmem>>, %arg6: memref<16x32xf32, #tpu.memory_space<vmem>>) attributes {dimension_semantics = [], scalar_prefetch = 0 : i64, scratch_operands = 0 : i64, tpu.core_type = #tpu.core_type<tc>} {
    %c0 = arith.constant 0 : index
    %c0_0 = arith.constant 0 : index
    %0 = vector.load %arg0[%c0, %c0_0] : memref<16x16xf32, #tpu.memory_space<vmem>>, vector<16x16xf32>
    %c0_1 = arith.constant 0 : index
    %c0_2 = arith.constant 0 : index
    %1 = vector.load %arg2[%c0_1, %c0_2] : memref<16x96xf32, #tpu.memory_space<vmem>>, vector<16x96xf32>
    %cst = arith.constant dense<0.000000e+00> : vector<16x96xf32>
    %2 = tpu.matmul %0, %1, %cst {dimension_numbers = #tpu.dot_dimension_numbers<[1], [0], [0], [1], [0, 0, 1, 1], [], []>} : vector<16x16xf32>, vector<16x96xf32>, vector<16x96xf32> -> vector<16x96xf32>
    %c0_3 = arith.constant 0 : index
    %c0_4 = arith.constant 0 : index
    %3 = vector.load %arg3[%c0_3, %c0_4] : memref<1x96xf32, #tpu.memory_space<vmem>>, vector<1x96xf32>
    %4 = vector.broadcast %3 : vector<1x96xf32> to vector<16x96xf32>
    %5 = arith.addf %2, %4 : vector<16x96xf32>
    %c0_5 = arith.constant 0 : index
    %c0_6 = arith.constant 0 : index
    %6 = vector.load %arg4[%c0_5, %c0_6] : memref<32x96xf32, #tpu.memory_space<vmem>>, vector<32x96xf32>
    %c0_7 = arith.constant 0 : index
    %c0_8 = arith.constant 0 : index
    %7 = vector.load %arg5[%c0_7, %c0_8] : memref<1x96xf32, #tpu.memory_space<vmem>>, vector<1x96xf32>
    %c0_9 = arith.constant 0 : index
    %c0_10 = arith.constant 0 : index
    %8 = vector.load %arg1[%c0_9, %c0_10] : memref<2x32xf32, #tpu.memory_space<vmem>>, vector<2x32xf32>
    %9 = vector.extract_strided_slice %5 {offsets = [0, 0], sizes = [2, 96], strides = [1, 1]} : vector<16x96xf32> to vector<2x96xf32>
    %cst_11 = arith.constant dense<0.000000e+00> : vector<2x96xf32>
    %10 = tpu.matmul %8, %6, %cst_11 {dimension_numbers = #tpu.dot_dimension_numbers<[1], [0], [0], [1], [0, 0, 1, 1], [], []>} : vector<2x32xf32>, vector<32x96xf32>, vector<2x96xf32> -> vector<2x96xf32>
    %11 = vector.broadcast %7 : vector<1x96xf32> to vector<2x96xf32>
    %12 = arith.addf %10, %11 : vector<2x96xf32>
    %13 = vector.extract_strided_slice %9 {offsets = [0, 0], sizes = [2, 32], strides = [1, 1]} : vector<2x96xf32> to vector<2x32xf32>
    %14 = vector.extract_strided_slice %12 {offsets = [0, 0], sizes = [2, 32], strides = [1, 1]} : vector<2x96xf32> to vector<2x32xf32>
    %15 = arith.addf %13, %14 : vector<2x32xf32>
    %16 = arith.negf %15 : vector<2x32xf32>
    %17 = math.exp %16 : vector<2x32xf32>
    %cst_12 = arith.constant 1.000000e+00 : f32
    %18 = vector.broadcast %cst_12 : f32 to vector<2x32xf32>
    %19 = arith.addf %18, %17 : vector<2x32xf32>
    %20 = arith.divf %18, %19 : vector<2x32xf32>
    %21 = vector.extract_strided_slice %9 {offsets = [0, 32], sizes = [2, 32], strides = [1, 1]} : vector<2x96xf32> to vector<2x32xf32>
    %22 = vector.extract_strided_slice %12 {offsets = [0, 32], sizes = [2, 32], strides = [1, 1]} : vector<2x96xf32> to vector<2x32xf32>
    %23 = arith.addf %21, %22 : vector<2x32xf32>
    %24 = arith.negf %23 : vector<2x32xf32>
    %25 = math.exp %24 : vector<2x32xf32>
    %cst_13 = arith.constant 1.000000e+00 : f32
    %26 = vector.broadcast %cst_13 : f32 to vector<2x32xf32>
    %27 = arith.addf %26, %25 : vector<2x32xf32>
    %28 = arith.divf %26, %27 : vector<2x32xf32>
    %29 = vector.extract_strided_slice %9 {offsets = [0, 64], sizes = [2, 32], strides = [1, 1]} : vector<2x96xf32> to vector<2x32xf32>
    %30 = vector.extract_strided_slice %12 {offsets = [0, 64], sizes = [2, 32], strides = [1, 1]} : vector<2x96xf32> to vector<2x32xf32>
    %31 = arith.mulf %20, %30 : vector<2x32xf32>
    %32 = arith.addf %29, %31 : vector<2x32xf32>
    %33 = math.tanh %32 : vector<2x32xf32>
    %cst_14 = arith.constant 1.000000e+00 : f32
    %34 = vector.broadcast %cst_14 : f32 to vector<2x32xf32>
    %35 = arith.subf %34, %28 : vector<2x32xf32>
    %36 = arith.mulf %35, %33 : vector<2x32xf32>
    %37 = arith.mulf %28, %8 : vector<2x32xf32>
    %38 = arith.addf %36, %37 : vector<2x32xf32>
    %c0_15 = arith.constant 0 : index
    %c0_16 = arith.constant 0 : index
    %39 = vector.load %arg6[%c0_15, %c0_16] : memref<16x32xf32, #tpu.memory_space<vmem>>, vector<2x32xf32>
    tpu.vector_store %arg6[%c0_15, %c0_16], %38 {strides = array<i32>} : memref<16x32xf32, #tpu.memory_space<vmem>>, vector<2x32xf32>,
    %40 = vector.extract_strided_slice %5 {offsets = [2, 0], sizes = [2, 96], strides = [1, 1]} : vector<16x96xf32> to vector<2x96xf32>
    %cst_17 = arith.constant dense<0.000000e+00> : vector<2x96xf32>
    %41 = tpu.matmul %38, %6, %cst_17 {dimension_numbers = #tpu.dot_dimension_numbers<[1], [0], [0], [1], [0, 0, 1, 1], [], []>} : vector<2x32xf32>, vector<32x96xf32>, vector<2x96xf32> -> vector<2x96xf32>
    %42 = vector.broadcast %7 : vector<1x96xf32> to vector<2x96xf32>
    %43 = arith.addf %41, %42 : vector<2x96xf32>
    %44 = vector.extract_strided_slice %40 {offsets = [0, 0], sizes = [2, 32], strides = [1, 1]} : vector<2x96xf32> to vector<2x32xf32>
    %45 = vector.extract_strided_slice %43 {offsets = [0, 0], sizes = [2, 32], strides = [1, 1]} : vector<2x96xf32> to vector<2x32xf32>
    %46 = arith.addf %44, %45 : vector<2x32xf32>
    %47 = arith.negf %46 : vector<2x32xf32>
    %48 = math.exp %47 : vector<2x32xf32>
    %cst_18 = arith.constant 1.000000e+00 : f32
    %49 = vector.broadcast %cst_18 : f32 to vector<2x32xf32>
    %50 = arith.addf %49, %48 : vector<2x32xf32>
    %51 = arith.divf %49, %50 : vector<2x32xf32>
    %52 = vector.extract_strided_slice %40 {offsets = [0, 32], sizes = [2, 32], strides = [1, 1]} : vector<2x96xf32> to vector<2x32xf32>
    %53 = vector.extract_strided_slice %43 {offsets = [0, 32], sizes = [2, 32], strides = [1, 1]} : vector<2x96xf32> to vector<2x32xf32>
    %54 = arith.addf %52, %53 : vector<2x32xf32>
    %55 = arith.negf %54 : vector<2x32xf32>
    %56 = math.exp %55 : vector<2x32xf32>
    %cst_19 = arith.constant 1.000000e+00 : f32
    %57 = vector.broadcast %cst_19 : f32 to vector<2x32xf32>
    %58 = arith.addf %57, %56 : vector<2x32xf32>
    %59 = arith.divf %57, %58 : vector<2x32xf32>
    %60 = vector.extract_strided_slice %40 {offsets = [0, 64], sizes = [2, 32], strides = [1, 1]} : vector<2x96xf32> to vector<2x32xf32>
    %61 = vector.extract_strided_slice %43 {offsets = [0, 64], sizes = [2, 32], strides = [1, 1]} : vector<2x96xf32> to vector<2x32xf32>
    %62 = arith.mulf %51, %61 : vector<2x32xf32>
    %63 = arith.addf %60, %62 : vector<2x32xf32>
    %64 = math.tanh %63 : vector<2x32xf32>
    %cst_20 = arith.constant 1.000000e+00 : f32
    %65 = vector.broadcast %cst_20 : f32 to vector<2x32xf32>
    %66 = arith.subf %65, %59 : vector<2x32xf32>
    %67 = arith.mulf %66, %64 : vector<2x32xf32>
    %68 = arith.mulf %59, %38 : vector<2x32xf32>
    %69 = arith.addf %67, %68 : vector<2x32xf32>
    %c2 = arith.constant 2 : index
    %c0_21 = arith.constant 0 : index
    %70 = vector.load %arg6[%c2, %c0_21] : memref<16x32xf32, #tpu.memory_space<vmem>>, vector<2x32xf32>
    tpu.vector_store %arg6[%c2, %c0_21], %69 {strides = array<i32>} : memref<16x32xf32, #tpu.memory_space<vmem>>, vector<2x32xf32>,
    %71 = vector.extract_strided_slice %5 {offsets = [4, 0], sizes = [2, 96], strides = [1, 1]} : vector<16x96xf32> to vector<2x96xf32>
    %cst_22 = arith.constant dense<0.000000e+00> : vector<2x96xf32>
    %72 = tpu.matmul %69, %6, %cst_22 {dimension_numbers = #tpu.dot_dimension_numbers<[1], [0], [0], [1], [0, 0, 1, 1], [], []>} : vector<2x32xf32>, vector<32x96xf32>, vector<2x96xf32> -> vector<2x96xf32>
    %73 = vector.broadcast %7 : vector<1x96xf32> to vector<2x96xf32>
    %74 = arith.addf %72, %73 : vector<2x96xf32>
    %75 = vector.extract_strided_slice %71 {offsets = [0, 0], sizes = [2, 32], strides = [1, 1]} : vector<2x96xf32> to vector<2x32xf32>
    %76 = vector.extract_strided_slice %74 {offsets = [0, 0], sizes = [2, 32], strides = [1, 1]} : vector<2x96xf32> to vector<2x32xf32>
    %77 = arith.addf %75, %76 : vector<2x32xf32>
    %78 = arith.negf %77 : vector<2x32xf32>
    %79 = math.exp %78 : vector<2x32xf32>
    %cst_23 = arith.constant 1.000000e+00 : f32
    %80 = vector.broadcast %cst_23 : f32 to vector<2x32xf32>
    %81 = arith.addf %80, %79 : vector<2x32xf32>
    %82 = arith.divf %80, %81 : vector<2x32xf32>
    %83 = vector.extract_strided_slice %71 {offsets = [0, 32], sizes = [2, 32], strides = [1, 1]} : vector<2x96xf32> to vector<2x32xf32>
    %84 = vector.extract_strided_slice %74 {offsets = [0, 32], sizes = [2, 32], strides = [1, 1]} : vector<2x96xf32> to vector<2x32xf32>
    %85 = arith.addf %83, %84 : vector<2x32xf32>
    %86 = arith.negf %85 : vector<2x32xf32>
    %87 = math.exp %86 : vector<2x32xf32>
    %cst_24 = arith.constant 1.000000e+00 : f32
    %88 = vector.broadcast %cst_24 : f32 to vector<2x32xf32>
    %89 = arith.addf %88, %87 : vector<2x32xf32>
    %90 = arith.divf %88, %89 : vector<2x32xf32>
    %91 = vector.extract_strided_slice %71 {offsets = [0, 64], sizes = [2, 32], strides = [1, 1]} : vector<2x96xf32> to vector<2x32xf32>
    %92 = vector.extract_strided_slice %74 {offsets = [0, 64], sizes = [2, 32], strides = [1, 1]} : vector<2x96xf32> to vector<2x32xf32>
    %93 = arith.mulf %82, %92 : vector<2x32xf32>
    %94 = arith.addf %91, %93 : vector<2x32xf32>
    %95 = math.tanh %94 : vector<2x32xf32>
    %cst_25 = arith.constant 1.000000e+00 : f32
    %96 = vector.broadcast %cst_25 : f32 to vector<2x32xf32>
    %97 = arith.subf %96, %90 : vector<2x32xf32>
    %98 = arith.mulf %97, %95 : vector<2x32xf32>
    %99 = arith.mulf %90, %69 : vector<2x32xf32>
    %100 = arith.addf %98, %99 : vector<2x32xf32>
    %c4 = arith.constant 4 : index
    %c0_26 = arith.constant 0 : index
    %101 = vector.load %arg6[%c4, %c0_26] : memref<16x32xf32, #tpu.memory_space<vmem>>, vector<2x32xf32>
    tpu.vector_store %arg6[%c4, %c0_26], %100 {strides = array<i32>} : memref<16x32xf32, #tpu.memory_space<vmem>>, vector<2x32xf32>,
    %102 = vector.extract_strided_slice %5 {offsets = [6, 0], sizes = [2, 96], strides = [1, 1]} : vector<16x96xf32> to vector<2x96xf32>
    %cst_27 = arith.constant dense<0.000000e+00> : vector<2x96xf32>
    %103 = tpu.matmul %100, %6, %cst_27 {dimension_numbers = #tpu.dot_dimension_numbers<[1], [0], [0], [1], [0, 0, 1, 1], [], []>} : vector<2x32xf32>, vector<32x96xf32>, vector<2x96xf32> -> vector<2x96xf32>
    %104 = vector.broadcast %7 : vector<1x96xf32> to vector<2x96xf32>
    %105 = arith.addf %103, %104 : vector<2x96xf32>
    %106 = vector.extract_strided_slice %102 {offsets = [0, 0], sizes = [2, 32], strides = [1, 1]} : vector<2x96xf32> to vector<2x32xf32>
    %107 = vector.extract_strided_slice %105 {offsets = [0, 0], sizes = [2, 32], strides = [1, 1]} : vector<2x96xf32> to vector<2x32xf32>
    %108 = arith.addf %106, %107 : vector<2x32xf32>
    %109 = arith.negf %108 : vector<2x32xf32>
    %110 = math.exp %109 : vector<2x32xf32>
    %cst_28 = arith.constant 1.000000e+00 : f32
    %111 = vector.broadcast %cst_28 : f32 to vector<2x32xf32>
    %112 = arith.addf %111, %110 : vector<2x32xf32>
    %113 = arith.divf %111, %112 : vector<2x32xf32>
    %114 = vector.extract_strided_slice %102 {offsets = [0, 32], sizes = [2, 32], strides = [1, 1]} : vector<2x96xf32> to vector<2x32xf32>
    %115 = vector.extract_strided_slice %105 {offsets = [0, 32], sizes = [2, 32], strides = [1, 1]} : vector<2x96xf32> to vector<2x32xf32>
    %116 = arith.addf %114, %115 : vector<2x32xf32>
    %117 = arith.negf %116 : vector<2x32xf32>
    %118 = math.exp %117 : vector<2x32xf32>
    %cst_29 = arith.constant 1.000000e+00 : f32
    %119 = vector.broadcast %cst_29 : f32 to vector<2x32xf32>
    %120 = arith.addf %119, %118 : vector<2x32xf32>
    %121 = arith.divf %119, %120 : vector<2x32xf32>
    %122 = vector.extract_strided_slice %102 {offsets = [0, 64], sizes = [2, 32], strides = [1, 1]} : vector<2x96xf32> to vector<2x32xf32>
    %123 = vector.extract_strided_slice %105 {offsets = [0, 64], sizes = [2, 32], strides = [1, 1]} : vector<2x96xf32> to vector<2x32xf32>
    %124 = arith.mulf %113, %123 : vector<2x32xf32>
    %125 = arith.addf %122, %124 : vector<2x32xf32>
    %126 = math.tanh %125 : vector<2x32xf32>
    %cst_30 = arith.constant 1.000000e+00 : f32
    %127 = vector.broadcast %cst_30 : f32 to vector<2x32xf32>
    %128 = arith.subf %127, %121 : vector<2x32xf32>
    %129 = arith.mulf %128, %126 : vector<2x32xf32>
    %130 = arith.mulf %121, %100 : vector<2x32xf32>
    %131 = arith.addf %129, %130 : vector<2x32xf32>
    %c6 = arith.constant 6 : index
    %c0_31 = arith.constant 0 : index
    %132 = vector.load %arg6[%c6, %c0_31] : memref<16x32xf32, #tpu.memory_space<vmem>>, vector<2x32xf32>
    tpu.vector_store %arg6[%c6, %c0_31], %131 {strides = array<i32>} : memref<16x32xf32, #tpu.memory_space<vmem>>, vector<2x32xf32>,
    %133 = vector.extract_strided_slice %5 {offsets = [8, 0], sizes = [2, 96], strides = [1, 1]} : vector<16x96xf32> to vector<2x96xf32>
    %cst_32 = arith.constant dense<0.000000e+00> : vector<2x96xf32>
    %134 = tpu.matmul %131, %6, %cst_32 {dimension_numbers = #tpu.dot_dimension_numbers<[1], [0], [0], [1], [0, 0, 1, 1], [], []>} : vector<2x32xf32>, vector<32x96xf32>, vector<2x96xf32> -> vector<2x96xf32>
    %135 = vector.broadcast %7 : vector<1x96xf32> to vector<2x96xf32>
    %136 = arith.addf %134, %135 : vector<2x96xf32>
    %137 = vector.extract_strided_slice %133 {offsets = [0, 0], sizes = [2, 32], strides = [1, 1]} : vector<2x96xf32> to vector<2x32xf32>
    %138 = vector.extract_strided_slice %136 {offsets = [0, 0], sizes = [2, 32], strides = [1, 1]} : vector<2x96xf32> to vector<2x32xf32>
    %139 = arith.addf %137, %138 : vector<2x32xf32>
    %140 = arith.negf %139 : vector<2x32xf32>
    %141 = math.exp %140 : vector<2x32xf32>
    %cst_33 = arith.constant 1.000000e+00 : f32
    %142 = vector.broadcast %cst_33 : f32 to vector<2x32xf32>
    %143 = arith.addf %142, %141 : vector<2x32xf32>
    %144 = arith.divf %142, %143 : vector<2x32xf32>
    %145 = vector.extract_strided_slice %133 {offsets = [0, 32], sizes = [2, 32], strides = [1, 1]} : vector<2x96xf32> to vector<2x32xf32>
    %146 = vector.extract_strided_slice %136 {offsets = [0, 32], sizes = [2, 32], strides = [1, 1]} : vector<2x96xf32> to vector<2x32xf32>
    %147 = arith.addf %145, %146 : vector<2x32xf32>
    %148 = arith.negf %147 : vector<2x32xf32>
    %149 = math.exp %148 : vector<2x32xf32>
    %cst_34 = arith.constant 1.000000e+00 : f32
    %150 = vector.broadcast %cst_34 : f32 to vector<2x32xf32>
    %151 = arith.addf %150, %149 : vector<2x32xf32>
    %152 = arith.divf %150, %151 : vector<2x32xf32>
    %153 = vector.extract_strided_slice %133 {offsets = [0, 64], sizes = [2, 32], strides = [1, 1]} : vector<2x96xf32> to vector<2x32xf32>
    %154 = vector.extract_strided_slice %136 {offsets = [0, 64], sizes = [2, 32], strides = [1, 1]} : vector<2x96xf32> to vector<2x32xf32>
    %155 = arith.mulf %144, %154 : vector<2x32xf32>
    %156 = arith.addf %153, %155 : vector<2x32xf32>
    %157 = math.tanh %156 : vector<2x32xf32>
    %cst_35 = arith.constant 1.000000e+00 : f32
    %158 = vector.broadcast %cst_35 : f32 to vector<2x32xf32>
    %159 = arith.subf %158, %152 : vector<2x32xf32>
    %160 = arith.mulf %159, %157 : vector<2x32xf32>
    %161 = arith.mulf %152, %131 : vector<2x32xf32>
    %162 = arith.addf %160, %161 : vector<2x32xf32>
    %c8 = arith.constant 8 : index
    %c0_36 = arith.constant 0 : index
    %163 = vector.load %arg6[%c8, %c0_36] : memref<16x32xf32, #tpu.memory_space<vmem>>, vector<2x32xf32>
    tpu.vector_store %arg6[%c8, %c0_36], %162 {strides = array<i32>} : memref<16x32xf32, #tpu.memory_space<vmem>>, vector<2x32xf32>,
    %164 = vector.extract_strided_slice %5 {offsets = [10, 0], sizes = [2, 96], strides = [1, 1]} : vector<16x96xf32> to vector<2x96xf32>
    %cst_37 = arith.constant dense<0.000000e+00> : vector<2x96xf32>
    %165 = tpu.matmul %162, %6, %cst_37 {dimension_numbers = #tpu.dot_dimension_numbers<[1], [0], [0], [1], [0, 0, 1, 1], [], []>} : vector<2x32xf32>, vector<32x96xf32>, vector<2x96xf32> -> vector<2x96xf32>
    %166 = vector.broadcast %7 : vector<1x96xf32> to vector<2x96xf32>
    %167 = arith.addf %165, %166 : vector<2x96xf32>
    %168 = vector.extract_strided_slice %164 {offsets = [0, 0], sizes = [2, 32], strides = [1, 1]} : vector<2x96xf32> to vector<2x32xf32>
    %169 = vector.extract_strided_slice %167 {offsets = [0, 0], sizes = [2, 32], strides = [1, 1]} : vector<2x96xf32> to vector<2x32xf32>
    %170 = arith.addf %168, %169 : vector<2x32xf32>
    %171 = arith.negf %170 : vector<2x32xf32>
    %172 = math.exp %171 : vector<2x32xf32>
    %cst_38 = arith.constant 1.000000e+00 : f32
    %173 = vector.broadcast %cst_38 : f32 to vector<2x32xf32>
    %174 = arith.addf %173, %172 : vector<2x32xf32>
    %175 = arith.divf %173, %174 : vector<2x32xf32>
    %176 = vector.extract_strided_slice %164 {offsets = [0, 32], sizes = [2, 32], strides = [1, 1]} : vector<2x96xf32> to vector<2x32xf32>
    %177 = vector.extract_strided_slice %167 {offsets = [0, 32], sizes = [2, 32], strides = [1, 1]} : vector<2x96xf32> to vector<2x32xf32>
    %178 = arith.addf %176, %177 : vector<2x32xf32>
    %179 = arith.negf %178 : vector<2x32xf32>
    %180 = math.exp %179 : vector<2x32xf32>
    %cst_39 = arith.constant 1.000000e+00 : f32
    %181 = vector.broadcast %cst_39 : f32 to vector<2x32xf32>
    %182 = arith.addf %181, %180 : vector<2x32xf32>
    %183 = arith.divf %181, %182 : vector<2x32xf32>
    %184 = vector.extract_strided_slice %164 {offsets = [0, 64], sizes = [2, 32], strides = [1, 1]} : vector<2x96xf32> to vector<2x32xf32>
    %185 = vector.extract_strided_slice %167 {offsets = [0, 64], sizes = [2, 32], strides = [1, 1]} : vector<2x96xf32> to vector<2x32xf32>
    %186 = arith.mulf %175, %185 : vector<2x32xf32>
    %187 = arith.addf %184, %186 : vector<2x32xf32>
    %188 = math.tanh %187 : vector<2x32xf32>
    %cst_40 = arith.constant 1.000000e+00 : f32
    %189 = vector.broadcast %cst_40 : f32 to vector<2x32xf32>
    %190 = arith.subf %189, %183 : vector<2x32xf32>
    %191 = arith.mulf %190, %188 : vector<2x32xf32>
    %192 = arith.mulf %183, %162 : vector<2x32xf32>
    %193 = arith.addf %191, %192 : vector<2x32xf32>
    %c10 = arith.constant 10 : index
    %c0_41 = arith.constant 0 : index
    %194 = vector.load %arg6[%c10, %c0_41] : memref<16x32xf32, #tpu.memory_space<vmem>>, vector<2x32xf32>
    tpu.vector_store %arg6[%c10, %c0_41], %193 {strides = array<i32>} : memref<16x32xf32, #tpu.memory_space<vmem>>, vector<2x32xf32>,
    %195 = vector.extract_strided_slice %5 {offsets = [12, 0], sizes = [2, 96], strides = [1, 1]} : vector<16x96xf32> to vector<2x96xf32>
    %cst_42 = arith.constant dense<0.000000e+00> : vector<2x96xf32>
    %196 = tpu.matmul %193, %6, %cst_42 {dimension_numbers = #tpu.dot_dimension_numbers<[1], [0], [0], [1], [0, 0, 1, 1], [], []>} : vector<2x32xf32>, vector<32x96xf32>, vector<2x96xf32> -> vector<2x96xf32>
    %197 = vector.broadcast %7 : vector<1x96xf32> to vector<2x96xf32>
    %198 = arith.addf %196, %197 : vector<2x96xf32>
    %199 = vector.extract_strided_slice %195 {offsets = [0, 0], sizes = [2, 32], strides = [1, 1]} : vector<2x96xf32> to vector<2x32xf32>
    %200 = vector.extract_strided_slice %198 {offsets = [0, 0], sizes = [2, 32], strides = [1, 1]} : vector<2x96xf32> to vector<2x32xf32>
    %201 = arith.addf %199, %200 : vector<2x32xf32>
    %202 = arith.negf %201 : vector<2x32xf32>
    %203 = math.exp %202 : vector<2x32xf32>
    %cst_43 = arith.constant 1.000000e+00 : f32
    %204 = vector.broadcast %cst_43 : f32 to vector<2x32xf32>
    %205 = arith.addf %204, %203 : vector<2x32xf32>
    %206 = arith.divf %204, %205 : vector<2x32xf32>
    %207 = vector.extract_strided_slice %195 {offsets = [0, 32], sizes = [2, 32], strides = [1, 1]} : vector<2x96xf32> to vector<2x32xf32>
    %208 = vector.extract_strided_slice %198 {offsets = [0, 32], sizes = [2, 32], strides = [1, 1]} : vector<2x96xf32> to vector<2x32xf32>
    %209 = arith.addf %207, %208 : vector<2x32xf32>
    %210 = arith.negf %209 : vector<2x32xf32>
    %211 = math.exp %210 : vector<2x32xf32>
    %cst_44 = arith.constant 1.000000e+00 : f32
    %212 = vector.broadcast %cst_44 : f32 to vector<2x32xf32>
    %213 = arith.addf %212, %211 : vector<2x32xf32>
    %214 = arith.divf %212, %213 : vector<2x32xf32>
    %215 = vector.extract_strided_slice %195 {offsets = [0, 64], sizes = [2, 32], strides = [1, 1]} : vector<2x96xf32> to vector<2x32xf32>
    %216 = vector.extract_strided_slice %198 {offsets = [0, 64], sizes = [2, 32], strides = [1, 1]} : vector<2x96xf32> to vector<2x32xf32>
    %217 = arith.mulf %206, %216 : vector<2x32xf32>
    %218 = arith.addf %215, %217 : vector<2x32xf32>
    %219 = math.tanh %218 : vector<2x32xf32>
    %cst_45 = arith.constant 1.000000e+00 : f32
    %220 = vector.broadcast %cst_45 : f32 to vector<2x32xf32>
    %221 = arith.subf %220, %214 : vector<2x32xf32>
    %222 = arith.mulf %221, %219 : vector<2x32xf32>
    %223 = arith.mulf %214, %193 : vector<2x32xf32>
    %224 = arith.addf %222, %223 : vector<2x32xf32>
    %c12 = arith.constant 12 : index
    %c0_46 = arith.constant 0 : index
    %225 = vector.load %arg6[%c12, %c0_46] : memref<16x32xf32, #tpu.memory_space<vmem>>, vector<2x32xf32>
    tpu.vector_store %arg6[%c12, %c0_46], %224 {strides = array<i32>} : memref<16x32xf32, #tpu.memory_space<vmem>>, vector<2x32xf32>,
    %226 = vector.extract_strided_slice %5 {offsets = [14, 0], sizes = [2, 96], strides = [1, 1]} : vector<16x96xf32> to vector<2x96xf32>
    %cst_47 = arith.constant dense<0.000000e+00> : vector<2x96xf32>
    %227 = tpu.matmul %224, %6, %cst_47 {dimension_numbers = #tpu.dot_dimension_numbers<[1], [0], [0], [1], [0, 0, 1, 1], [], []>} : vector<2x32xf32>, vector<32x96xf32>, vector<2x96xf32> -> vector<2x96xf32>
    %228 = vector.broadcast %7 : vector<1x96xf32> to vector<2x96xf32>
    %229 = arith.addf %227, %228 : vector<2x96xf32>
    %230 = vector.extract_strided_slice %226 {offsets = [0, 0], sizes = [2, 32], strides = [1, 1]} : vector<2x96xf32> to vector<2x32xf32>
    %231 = vector.extract_strided_slice %229 {offsets = [0, 0], sizes = [2, 32], strides = [1, 1]} : vector<2x96xf32> to vector<2x32xf32>
    %232 = arith.addf %230, %231 : vector<2x32xf32>
    %233 = arith.negf %232 : vector<2x32xf32>
    %234 = math.exp %233 : vector<2x32xf32>
    %cst_48 = arith.constant 1.000000e+00 : f32
    %235 = vector.broadcast %cst_48 : f32 to vector<2x32xf32>
    %236 = arith.addf %235, %234 : vector<2x32xf32>
    %237 = arith.divf %235, %236 : vector<2x32xf32>
    %238 = vector.extract_strided_slice %226 {offsets = [0, 32], sizes = [2, 32], strides = [1, 1]} : vector<2x96xf32> to vector<2x32xf32>
    %239 = vector.extract_strided_slice %229 {offsets = [0, 32], sizes = [2, 32], strides = [1, 1]} : vector<2x96xf32> to vector<2x32xf32>
    %240 = arith.addf %238, %239 : vector<2x32xf32>
    %241 = arith.negf %240 : vector<2x32xf32>
    %242 = math.exp %241 : vector<2x32xf32>
    %cst_49 = arith.constant 1.000000e+00 : f32
    %243 = vector.broadcast %cst_49 : f32 to vector<2x32xf32>
    %244 = arith.addf %243, %242 : vector<2x32xf32>
    %245 = arith.divf %243, %244 : vector<2x32xf32>
    %246 = vector.extract_strided_slice %226 {offsets = [0, 64], sizes = [2, 32], strides = [1, 1]} : vector<2x96xf32> to vector<2x32xf32>
    %247 = vector.extract_strided_slice %229 {offsets = [0, 64], sizes = [2, 32], strides = [1, 1]} : vector<2x96xf32> to vector<2x32xf32>
    %248 = arith.mulf %237, %247 : vector<2x32xf32>
    %249 = arith.addf %246, %248 : vector<2x32xf32>
    %250 = math.tanh %249 : vector<2x32xf32>
    %cst_50 = arith.constant 1.000000e+00 : f32
    %251 = vector.broadcast %cst_50 : f32 to vector<2x32xf32>
    %252 = arith.subf %251, %245 : vector<2x32xf32>
    %253 = arith.mulf %252, %250 : vector<2x32xf32>
    %254 = arith.mulf %245, %224 : vector<2x32xf32>
    %255 = arith.addf %253, %254 : vector<2x32xf32>
    %c14 = arith.constant 14 : index
    %c0_51 = arith.constant 0 : index
    %256 = vector.load %arg6[%c14, %c0_51] : memref<16x32xf32, #tpu.memory_space<vmem>>, vector<2x32xf32>
    tpu.vector_store %arg6[%c14, %c0_51], %255 {strides = array<i32>} : memref<16x32xf32, #tpu.memory_space<vmem>>, vector<2x32xf32>,
    return
  }
}

</mosaic_0001>

<bundles_post_ra>
// kernel: tpu_custom_call.1
= control target key start
LH: loop header
LB: loop body
LE: loop exit
PB: predicated region body
PF: predicated region fallthrough
CT: control target
= control target key end

     0   :  { %11 = vsyncpa [#allocation3], 0  ;;  %s1703_s0 = inlined_call_operand.hbm [shape: f32[16,16], index: 0, kind: input, shape index: {}]   ;;  %s1704_s1 = inlined_call_operand.vmem [shape: f32[2,32], index: 1, kind: input, shape index: {}]   ;;  %s1705_s2 = inlined_call_operand.hbm [shape: f32[16,96], index: 2, kind: input, shape index: {}]   ;;  %s1706_s3 = inlined_call_operand.vmem [shape: f32[1,96], index: 3, kind: input, shape index: {}]   ;;  %s1707_s4 = inlined_call_operand.hbm [shape: f32[32,96], index: 4, kind: input, shape index: {}]   ;;  %s1708_s5 = inlined_call_operand.vmem [shape: f32[1,96], index: 5, kind: input, shape index: {}]   ;;  %s1709_s6 = inlined_call_operand.hbm [shape: f32[16,32], index: 6, kind: output, shape index: {}]  }
   0x1   :  { %12 = vsyncpa [#allocation6], 0 }
   0x2   :  { %13 = vsyncpa [#allocation4], 0  ;;  %s1426_s21 = smov [#allocation5]   ;;  %s1427_s23 = smov [#allocation2]  }
   0x3   :  { %s33_s22 = sshll.u32 %s1426_s21, 4  ;;  %s19_s24 = sshll.u32 %s1427_s23, 4  ;;  %s34_s22 = int_to_ptr.vmem [resolvable:$true] %s33_s22  ;;  %s1473_s24 = int_to_ptr.vmem [resolvable:$true] %s19_s24 }
   0x4   :  { %s1332_s27 = scalar_lea.hbm %s1705_s2, 256 }
   0x5   :  { %p1333_p0 = scmp.ne.s32.totalorder %s1705_s2, %s1332_s27  ;;  %p1336_p1 = scmp.lt.u32.totalorder %s1332_s27, %s1705_s2 }
   0x7   :  { %p1338_p2 = pnand %p1336_p1, %p1333_p0 }
   0x9   :  { %1341 = shalt.err (!%p1338_p2)
}
   0xa   :  { %s1342_s8 = scalar_lea.vmem %s34_s22, 256  ;;  %p1347_p4 = scmp.lt.s32.totalorder %s34_s22, %s34_s22 }
   0xb   :  { %p1343_p3 = scmp.ne.s32.totalorder %s34_s22, %s1342_s8  ;;  %p1348_p5 = scmp.lt.s32.totalorder %s1342_s8, %s1342_s8 }
   0xd   :  { %p1349_p6 = por %p1348_p5, %p1347_p4 }
   0xf   :  { %p1350_p7 = pnand %p1349_p6, %p1343_p3 }
  0x11   :  { %1353 = shalt.err (!%p1350_p7)
}
  0x12   :  { %s1428_s9 = smov 128   ;;  %s1429_s10 = smov 8  }
  0x13   :  { %39 = dma.hbm_to_vmem [thread:$0]  %s1705_s2, 256, %s34_s22, [#allocation6], %s1428_s9, %s1428_s9, %s1429_s10  }
  0x14   :  { %s1354_s15 = scalar_lea.hbm %s1703_s0, 256 }
  0x15   :  { %p1355_p8 = scmp.ne.s32.totalorder %s1703_s0, %s1354_s15  ;;  %p1358_p9 = scmp.lt.u32.totalorder %s1354_s15, %s1703_s0 }
  0x17   :  { %p1360_p10 = pnand %p1358_p9, %p1355_p8 }
  0x19   :  { %1363 = shalt.err (!%p1360_p10)
}
  0x1a   :  { %s1364_s20 = scalar_lea.vmem %s1473_s24, 256  ;;  %p1369_p12 = scmp.lt.s32.totalorder %s1473_s24, %s1473_s24 }
  0x1b   :  { %p1365_p11 = scmp.ne.s32.totalorder %s1473_s24, %s1364_s20  ;;  %p1370_p13 = scmp.lt.s32.totalorder %s1364_s20, %s1364_s20 }
  0x1d   :  { %p1371_p0 = por %p1370_p13, %p1369_p12 }
  0x1f   :  { %p1372_p1 = pnand %p1371_p0, %p1365_p11 }
  0x21   :  { %1375 = shalt.err (!%p1372_p1)
}
  0x22   :  { %25 = dma.hbm_to_vmem [thread:$0]  %s1703_s0, 256, %s1473_s24, [#allocation3], %s1428_s9, %s1428_s9, %s1429_s10  }
  0x23   :  { %s1430_s22 = smov [#allocation7]   ;;  %s1376_s27 = scalar_lea.hbm %s1707_s4, 512 }
  0x24   :  { %s47_s23 = sshll.u32 %s1430_s22, 4  ;;  %p1377_p2 = scmp.ne.s32.totalorder %s1707_s4, %s1376_s27  ;;  %s48_s23 = int_to_ptr.vmem [resolvable:$true] %s47_s23 }
  0x25   :  { %p1380_p3 = scmp.lt.u32.totalorder %s1376_s27, %s1707_s4 }
  0x27   :  { %p1382_p4 = pnand %p1380_p3, %p1377_p2 }
  0x29   :  { %1385 = shalt.err (!%p1382_p4)
}
  0x2a   :  { %s1386_s8 = scalar_lea.vmem %s48_s23, 512  ;;  %p1391_p6 = scmp.lt.s32.totalorder %s48_s23, %s48_s23 }
  0x2b   :  { %p1387_p5 = scmp.ne.s32.totalorder %s48_s23, %s1386_s8  ;;  %p1392_p7 = scmp.lt.s32.totalorder %s1386_s8, %s1386_s8 }
  0x2d   :  { %p1393_p8 = por %p1392_p7, %p1391_p6 }
  0x2f   :  { %p1394_p9 = pnand %p1393_p8, %p1387_p5 }
  0x31   :  { %1397 = shalt.err (!%p1394_p9)
}
  0x32   :  { %53 = dma.hbm_to_vmem [thread:$0]  %s1707_s4, 512, %s48_s23, [#allocation6], %s1428_s9, %s1428_s9, %s1429_s10  }
  0x33   :  { %1420 = dma.done.wait [#allocation3], 256  }
  0x34   :  { %1421 = vsyncadd [#allocation3], 4294967040 }
  0x35   :  { %1422 = dma.done.wait [#allocation6], 768  }
  0x36   :  { %1423 = vsyncadd [#allocation6], 4294966528  ;;  %v1431_v0 = vmov 0.0|0.0   ;;  %vm1432_vm0 = vmmov 0   ;;  %v1433_v1 = vmov 0.0   ;;  %v158_v2 = vld [vmem:[#allocation7] sm:$0xff] }
  0x37   :  { %1224 = vmatprep.subr.bf16.mxu1 %v1431_v0  ;;  %1140 = vmatprep.mubr.msk.f32.mxu1 %vm1432_vm0, %v1433_v1  ;;  %v159_v3 = vld [vmem:[#allocation7 + $0x8] sm:$0xff]  ;;  %v67_v4 = vld [vmem:[#allocation5] sm:$0xff]  ;;  %vm76_vm1 = vcmask 130048   ;;  %v68_v6 = vld [vmem:[#allocation5 + $0x8] sm:$0xff]  ;;  %vm170_vm2 = vcmask 261120   ;;  %s1434_s15 = smov 64  }
  0x38   :  { %v1528_v5 = vpack.c.bf16 %v159_v3, %v158_v2  ;;  %v160_v7 = vld [vmem:[#allocation7 + $0x10] sm:$0xff]  ;;  %v161_v8 = vld [vmem:[#allocation7 + $0x18] sm:$0xff]  ;;  %v1220_v9 = vpack.c.bf16 %v68_v6, %v67_v4  ;;  %v65_v10 = vld [vmem:[#allocation2] sm:$0xff]  ;;  %vm277_vm3 = vcmask 254976   ;;  %vm385_vm4 = vcmask 257026   ;;  %s1437_s16 = smov [#allocation8]  }
  0x39   :  { %v1531_v11 = vpack.c.bf16 %v161_v8, %v160_v7  ;;  %1129 = vmatprep.mubr.msk.f32.mxu0 %vm76_vm1, %v65_v10  ;;  %v66_v12 = vld [vmem:[#allocation2 + $0x8] sm:$0xff]  ;;  %v163_v13 = vld [vmem:[%s1704_s1] sm:$0x3]  ;;  %vm607_vm5 = vcmask 261126   ;;  %vm496_vm6 = vcmask 259076   ;;  %s1048_s17 = sshll.u32 %s1437_s16, 4  ;;  %s1049_s17 = int_to_ptr.vmem [resolvable:$true] %s1048_s17 }
  0x3a   :  { %1226 = vmatpush3.bf16.msra.mxu1 %v1528_v5  ;;  %1221 = vmatprep.subr.bf16.mxu0 %v1220_v9  ;;  %v1061_v15 = vld [vmem:[%s1706_s3] ss:$0 sm:$0xff]  ;;  %s1435_s3 = smov 96   ;;  %s1398_s18 = scalar_lea.vmem %s1049_s17, 256 }
  0x3b   :  { %1227 = vmatprep.subr.bf16.mxu1 %v1431_v0  ;;  %1223 = vmatpush3.bf16.msra.mxu0 %v1220_v9  ;;  %v1561_v16 = vld [vmem:[%s1708_s5] ss:$0 sm:$0xff]  ;;  %s1436_s5 = smov 32   ;;  %p1399_p10 = scmp.ne.s32.totalorder %s1049_s17, %s1398_s18 }
  0x3c   :  { %1230 = vmatprep.subr.bf16.mxu0 %v1431_v0  ;;  %p1403_p11 = scmp.lt.s32.totalorder %s1049_s17, %s1049_s17  ;;  %p1404_p12 = scmp.lt.s32.totalorder %s1398_s18, %s1398_s18 }
  0x3e   :  { %1229 = vmatpush3.bf16.msra.mxu1 %v1531_v11  ;;  %1130 = vmatmul.mubr.msk.f32.vlgmr.msra.gmra.mrb[0].mxu0 %vm76_vm1, %v66_v12  ;;  %p1405_p13 = por %p1404_p12, %p1403_p11 }
  0x3f   :  { %1236 = vmatprep.subr.bf16.mxu1 %v1431_v0  ;;  %1232 = vmatpush3.bf16.msra.mxu0 %v1528_v5 }
  0x40   :  { %1151 = vmatprep.mubr.msk.f32.mxu0 %vm1432_vm0, %v1433_v1  ;;  %1233 = vmatprep.subr.bf16.mxu0 %v1431_v0  ;;  %p1406_p0 = pnand %p1405_p13, %p1399_p10 }
  0x41   :  { %1141 = vmatmul.mubr.msk.f32.vlgmr.msra.gmra.mrb[0].mxu1 %vm170_vm2, %v163_v13 }
  0x42   :  { %1238 = vmatpush3.bf16.msra.mxu1 %v1528_v5  ;;  %1162 = vmatprep.mubr.msk.f32.mxu1 %vm1432_vm0, %v1433_v1 }
  0x43   :  { %1239 = vmatprep.subr.bf16.mxu1 %v1431_v0  ;;  %1235 = vmatpush3.bf16.msra.mxu0 %v1531_v11 }
  0x44   :  { %1242 = vmatprep.subr.bf16.mxu0 %v1431_v0 }
  0x46   :  { %1241 = vmatpush3.bf16.msra.mxu1 %v1531_v11 }
  0x47   :  { %1248 = vmatprep.subr.bf16.mxu1 %v1431_v0 }
 0x111   :  { %v1131_v14 = vpop.f32.mrb[0].mxu0 }
 0x112   :  { %v1563_v17 = vadd.f32 %v1131_v14, %v1061_v15  ;;  %v149_v18 = vpop.f32.mrb[1].mxu0 }
 0x113   :  { %v1567_v22 = vadd.f32 %v1061_v15, %v149_v18 }
 0x114   :  { %v240_v19 = vpop.f32.mrb[0].mxu1 }
 0x115   :  { %v241_v20 = vadd.f32 %v1561_v16, %v240_v19  ;;  %v1142_v21 = vpop.f32.mrb[1].mxu1 }
 0x117   :  { %252 = vrot.lane.b32.xlu0 %v241_v20, %s1434_s15  ;;  %v244_v23 = vadd.f32 %v241_v20, %v1567_v22 }
 0x119   :  { %v1066_v24 = vmul.f32 -1.442695, %v244_v23 }
 0x11b   :  { %1284 = vpow2.f32 %v1066_v24 }
 0x125   :  { %v1285_v25 = vpop.eup %1284 }
 0x126   :  { %v248_v26 = vadd.f32 1.0, %v1285_v25 }
 0x128   :  { %1286 = vrcp.f32 %v248_v26 }
 0x132   :  { %v1287_v27 = vpop.eup %1286 }
 0x133   :  { %v262_v34 = vsub.f32 1.0, %v1287_v27 }
 0x189   :  { %v253_v28 = vpop.permute.xlu0 %252 }
 0x18a   :  { %v255_v29 = vmul.f32 %v1287_v27, %v253_v28 }
 0x18c   :  { %257 = vrot.lane.b32.xlu0 %v255_v29, %s1434_s15 }
 0x1fe   :  { %v258_v30 = vpop.permute.xlu0 %257 }
 0x1ff   :  { %v260_v31 = vadd.f32 %v258_v30, %v1567_v22 }
 0x201   :  { %1288 = vtanh.f32 %v260_v31 }
 0x20b   :  { %v1289_v32 = vpop.eup %1288 }
 0x20c   :  { %264 = vrot.lane.b32.xlu1 %v1289_v32, %s1435_s3 }
 0x210   :  { %268 = vrot.lane.b32.xlu1 %v163_v13, %s1436_s5 }
 0x27e   :  { %v265_v33 = vpop.permute.xlu1 %264 }
 0x27f   :  { %v267_v36 = vmul.f32 %v265_v33, %v262_v34 }
 0x282   :  { %v269_v35 = vpop.permute.xlu1 %268 }
 0x283   :  { %v271_v37 = vmul.f32 %v1287_v27, %v269_v35 }
 0x285   :  { %v272_v38 = vadd.f32 %v271_v37, %v267_v36 }
 0x287   :  { %274 = vrot.lane.b32.xlu0 %v272_v38, %s1435_s3  ;;  %v377_v54 = vrot.slane %v272_v38, 6 }
 0x2f9   :  { %v275_v39 = vpop.permute.xlu0 %274 }
 0x2fa   :  { %278 = vst.msk [vmem:[#allocation8] sm:$0x3] %vm277_vm3, %v275_v39  ;;  %1152 = vmatmul.mubr.msk.f32.vlgmr.msra.gmra.mrb[2].mxu0 %vm170_vm2, %v275_v39 }
 0x2fb   :  { %1244 = vmatpush3.bf16.msra.mxu0 %v1528_v5  ;;  %1173 = vmatprep.mubr.msk.f32.mxu0 %vm1432_vm0, %v1433_v1 }
 0x2fc   :  { %1245 = vmatprep.subr.bf16.mxu0 %v1431_v0 }
 0x2ff   :  { %1247 = vmatpush3.bf16.msra.mxu0 %v1531_v11 }
 0x300   :  { %1254 = vmatprep.subr.bf16.mxu0 %v1431_v0 }
 0x3cd   :  { %v347_v40 = vpop.f32.mrb[2].mxu0 }
 0x3ce   :  { %v348_v41 = vadd.f32 %v1561_v16, %v347_v40  ;;  %v1153_v42 = vpop.f32.mrb[3].mxu0 }
 0x3d0   :  { %v352_v43 = vrot.slane %v348_v41, 6 }
 0x3d2   :  { %361 = vrot.lane.b32.xlu1 %v352_v43, %s1434_s15  ;;  %v354_v44 = vadd.f32 %v352_v43, %v1567_v22 }
 0x3d4   :  { %v1068_v45 = vmul.f32 -1.442695, %v354_v44 }
 0x3d6   :  { %1290 = vpow2.f32 %v1068_v45 }
 0x3e0   :  { %v1291_v46 = vpop.eup %1290 }
 0x3e1   :  { %v358_v47 = vadd.f32 1.0, %v1291_v46 }
 0x3e3   :  { %1292 = vrcp.f32 %v358_v47 }
 0x3ed   :  { %v1293_v48 = vpop.eup %1292 }
 0x3ee   :  { %v371_v55 = vsub.f32 1.0, %v1293_v48  ;;  %v379_v58 = vmul.f32 %v1293_v48, %v377_v54 }
 0x444   :  { %v362_v49 = vpop.permute.xlu1 %361 }
 0x445   :  { %v364_v50 = vmul.f32 %v1293_v48, %v362_v49 }
 0x447   :  { %366 = vrot.lane.b32.xlu0 %v364_v50, %s1434_s15 }
 0x4b9   :  { %v367_v51 = vpop.permute.xlu0 %366 }
 0x4ba   :  { %v369_v52 = vadd.f32 %v367_v51, %v1567_v22 }
 0x4bc   :  { %1294 = vtanh.f32 %v369_v52 }
 0x4c6   :  { %v1295_v53 = vpop.eup %1294 }
 0x4c7   :  { %373 = vrot.lane.b32.xlu1 %v1295_v53, %s1435_s3 }
 0x539   :  { %v374_v56 = vpop.permute.xlu1 %373 }
 0x53a   :  { %v376_v57 = vmul.f32 %v374_v56, %v371_v55 }
 0x53c   :  { %v1588_v59 = vadd.f32 %v379_v58, %v376_v57 }
 0x53e   :  { %v387_v60 = vrot.slane %v1588_v59, 2  ;;  %v488_v19 = vrot.slane %v1588_v59, 6 }
 0x540   :  { %388 = vrot.lane.b32.xlu0 %v387_v60, %s1435_s3 }
 0x5b2   :  { %v389_v61 = vpop.permute.xlu0 %388 }
 0x5b3   :  { %1163 = vmatmul.mubr.msk.f32.vlgmr.msra.gmra.mrb[2].mxu1 %vm170_vm2, %v389_v61 }
 0x5b4   :  { %1250 = vmatpush3.bf16.msra.mxu1 %v1528_v5  ;;  %1184 = vmatprep.mubr.msk.f32.mxu1 %vm1432_vm0, %v1433_v1 }
 0x5b5   :  { %1251 = vmatprep.subr.bf16.mxu1 %v1431_v0 }
 0x5b8   :  { %1253 = vmatpush3.bf16.msra.mxu1 %v1531_v11 }
 0x5b9   :  { %1260 = vmatprep.subr.bf16.mxu1 %v1431_v0 }
 0x686   :  { %v458_v62 = vpop.f32.mrb[2].mxu1 }
 0x687   :  { %v459_v63 = vadd.f32 %v1561_v16, %v458_v62  ;;  %v1164_v2 = vpop.f32.mrb[3].mxu1 }
 0x689   :  { %v463_v3 = vrot.slane %v459_v63, 4 }
 0x68b   :  { %472 = vrot.lane.b32.xlu1 %v463_v3, %s1434_s15  ;;  %v465_v4 = vadd.f32 %v463_v3, %v1567_v22 }
 0x68d   :  { %v1070_v6 = vmul.f32 -1.442695, %v465_v4 }
 0x68f   :  { %1296 = vpow2.f32 %v1070_v6 }
 0x699   :  { %v1297_v7 = vpop.eup %1296 }
 0x69a   :  { %v469_v8 = vadd.f32 1.0, %v1297_v7 }
 0x69c   :  { %1298 = vrcp.f32 %v469_v8 }
 0x6a6   :  { %v1299_v9 = vpop.eup %1298 }
 0x6a7   :  { %v482_v18 = vsub.f32 1.0, %v1299_v9  ;;  %v490_v21 = vmul.f32 %v1299_v9, %v488_v19 }
 0x6fd   :  { %v473_v10 = vpop.permute.xlu1 %472 }
 0x6fe   :  { %v475_v12 = vmul.f32 %v1299_v9, %v473_v10 }
 0x700   :  { %477 = vrot.lane.b32.xlu0 %v475_v12, %s1434_s15 }
 0x772   :  { %v478_v13 = vpop.permute.xlu0 %477 }
 0x773   :  { %v480_v14 = vadd.f32 %v478_v13, %v1567_v22 }
 0x775   :  { %1300 = vtanh.f32 %v480_v14 }
 0x77f   :  { %v1301_v15 = vpop.eup %1300 }
 0x780   :  { %484 = vrot.lane.b32.xlu1 %v1301_v15, %s1435_s3 }
 0x7f2   :  { %v485_v20 = vpop.permute.xlu1 %484 }
 0x7f3   :  { %v487_v23 = vmul.f32 %v485_v20, %v482_v18 }
 0x7f5   :  { %v1606_v24 = vadd.f32 %v490_v21, %v487_v23 }
 0x7f7   :  { %v498_v25 = vrot.slane %v1606_v24, 4  ;;  %v599_v42 = vrot.slane %v1606_v24, 6 }
 0x7f9   :  { %499 = vrot.lane.b32.xlu0 %v498_v25, %s1435_s3 }
 0x86b   :  { %v500_v26 = vpop.permute.xlu0 %499 }
 0x86c   :  { %1174 = vmatmul.mubr.msk.f32.vlgmr.msra.gmra.mrb[4].mxu0 %vm170_vm2, %v500_v26 }
 0x86d   :  { %1256 = vmatpush3.bf16.msra.mxu0 %v1528_v5  ;;  %1195 = vmatprep.mubr.msk.f32.mxu0 %vm1432_vm0, %v1433_v1 }
 0x86e   :  { %1257 = vmatprep.subr.bf16.mxu0 %v1431_v0 }
 0x871   :  { %1259 = vmatpush3.bf16.msra.mxu0 %v1531_v11 }
 0x872   :  { %1266 = vmatprep.subr.bf16.mxu0 %v1431_v0 }
 0x93f   :  { %v569_v27 = vpop.f32.mrb[4].mxu0 }
 0x940   :  { %v570_v28 = vadd.f32 %v1561_v16, %v569_v27  ;;  %v1175_v29 = vpop.f32.mrb[5].mxu0 }
 0x942   :  { %v574_v30 = vrot.slane %v570_v28, 2 }
 0x944   :  { %583 = vrot.lane.b32.xlu1 %v574_v30, %s1434_s15  ;;  %v576_v31 = vadd.f32 %v574_v30, %v1567_v22 }
 0x946   :  { %v1072_v32 = vmul.f32 -1.442695, %v576_v31 }
 0x948   :  { %1302 = vpow2.f32 %v1072_v32 }
 0x952   :  { %v1303_v33 = vpop.eup %1302 }
 0x953   :  { %v580_v34 = vadd.f32 1.0, %v1303_v33 }
 0x955   :  { %1304 = vrcp.f32 %v580_v34 }
 0x95f   :  { %v1305_v35 = vpop.eup %1304 }
 0x960   :  { %v593_v41 = vsub.f32 1.0, %v1305_v35  ;;  %v601_v44 = vmul.f32 %v1305_v35, %v599_v42 }
 0x9b6   :  { %v584_v36 = vpop.permute.xlu1 %583 }
 0x9b7   :  { %v586_v37 = vmul.f32 %v1305_v35, %v584_v36 }
 0x9b9   :  { %588 = vrot.lane.b32.xlu0 %v586_v37, %s1434_s15 }
 0xa2b   :  { %v589_v38 = vpop.permute.xlu0 %588 }
 0xa2c   :  { %v591_v39 = vadd.f32 %v589_v38, %v1567_v22 }
 0xa2e   :  { %1306 = vtanh.f32 %v591_v39 }
 0xa38   :  { %v1307_v40 = vpop.eup %1306 }
 0xa39   :  { %595 = vrot.lane.b32.xlu1 %v1307_v40, %s1435_s3 }
 0xaab   :  { %v596_v43 = vpop.permute.xlu1 %595 }
 0xaac   :  { %v598_v45 = vmul.f32 %v596_v43, %v593_v41 }
 0xaae   :  { %v1624_v46 = vadd.f32 %v601_v44, %v598_v45 }
 0xab0   :  { %v609_v47 = vrot.slane %v1624_v46, 6 }
 0xab2   :  { %610 = vrot.lane.b32.xlu0 %v609_v47, %s1435_s3 }
 0xb24   :  { %v611_v48 = vpop.permute.xlu0 %610 }
 0xb25   :  { %1185 = vmatmul.mubr.msk.f32.vlgmr.msra.gmra.mrb[4].mxu1 %vm170_vm2, %v611_v48 }
 0xb26   :  { %1262 = vmatpush3.bf16.msra.mxu1 %v1528_v5  ;;  %1206 = vmatprep.mubr.msk.f32.mxu1 %vm1432_vm0, %v1433_v1 }
 0xb27   :  { %1263 = vmatprep.subr.bf16.mxu1 %v1431_v0 }
 0xb2a   :  { %1265 = vmatpush3.bf16.msra.mxu1 %v1531_v11 }
 0xbf8   :  { %v680_v22 = vpop.f32.mrb[4].mxu1 }
 0xbf9   :  { %v681_v49 = vadd.f32 %v1561_v16, %v680_v22  ;;  %v1186_v50 = vpop.f32.mrb[5].mxu1 }
 0xbfb   :  { %692 = vrot.lane.b32.xlu1 %v681_v49, %s1434_s15  ;;  %v684_v51 = vadd.f32 %v681_v49, %v1563_v17 }
 0xbfd   :  { %v1074_v52 = vmul.f32 -1.442695, %v684_v51 }
 0xbff   :  { %1308 = vpow2.f32 %v1074_v52 }
 0xc09   :  { %v1309_v53 = vpop.eup %1308 }
 0xc0a   :  { %v688_v54 = vadd.f32 1.0, %v1309_v53 }
 0xc0c   :  { %1310 = vrcp.f32 %v688_v54 }
 0xc16   :  { %v1311_v55 = vpop.eup %1310 }
 0xc17   :  { %v702_v62 = vsub.f32 1.0, %v1311_v55  ;;  %v709_v2 = vmul.f32 %v1311_v55, %v609_v47 }
 0xc6d   :  { %v693_v56 = vpop.permute.xlu1 %692 }
 0xc6e   :  { %v695_v57 = vmul.f32 %v1311_v55, %v693_v56 }
 0xc70   :  { %697 = vrot.lane.b32.xlu0 %v695_v57, %s1434_s15 }
 0xce2   :  { %v698_v58 = vpop.permute.xlu0 %697 }
 0xce3   :  { %v700_v60 = vadd.f32 %v698_v58, %v1563_v17 }
 0xce5   :  { %1312 = vtanh.f32 %v700_v60 }
 0xcef   :  { %v1313_v61 = vpop.eup %1312 }
 0xcf0   :  { %704 = vrot.lane.b32.xlu1 %v1313_v61, %s1435_s3 }
 0xd62   :  { %v705_v63 = vpop.permute.xlu1 %704 }
 0xd63   :  { %v707_v3 = vmul.f32 %v705_v63, %v702_v62 }
 0xd65   :  { %v710_v4 = vadd.f32 %v709_v2, %v707_v3 }
 0xd67   :  { %712 = vrot.lane.b32.xlu0 %v710_v4, %s1435_s3  ;;  %v814_v20 = vrot.slane %v710_v4, 6 }
 0xdd9   :  { %v713_v6 = vpop.permute.xlu0 %712 }
 0xdda   :  { %715 = vst.msk [vmem:[#allocation8 + $0x8] sm:$0x3] %vm277_vm3, %v713_v6  ;;  %1196 = vmatmul.mubr.msk.f32.vlgmr.msra.gmra.mrb[6].mxu0 %vm170_vm2, %v713_v6 }
 0xddb   :  { %1268 = vmatpush3.bf16.msra.mxu0 %v1528_v5  ;;  %1217 = vmatprep.mubr.msk.f32.mxu0 %vm1432_vm0, %v1433_v1 }
 0xddc   :  { %1269 = vmatprep.subr.bf16.mxu0 %v1431_v0 }
 0xddf   :  { %1271 = vmatpush3.bf16.msra.mxu0 %v1531_v11 }
 0xead   :  { %v784_v7 = vpop.f32.mrb[6].mxu0 }
 0xeae   :  { %v785_v8 = vadd.f32 %v1561_v16, %v784_v7  ;;  %v1197_v9 = vpop.f32.mrb[7].mxu0 }
 0xeb0   :  { %v789_v10 = vrot.slane %v785_v8, 6 }
 0xeb2   :  { %798 = vrot.lane.b32.xlu1 %v789_v10, %s1434_s15  ;;  %v791_v12 = vadd.f32 %v789_v10, %v1563_v17 }
 0xeb4   :  { %v1076_v13 = vmul.f32 -1.442695, %v791_v12 }
 0xeb6   :  { %1314 = vpow2.f32 %v1076_v13 }
 0xec0   :  { %v1315_v14 = vpop.eup %1314 }
 0xec1   :  { %v795_v5 = vadd.f32 1.0, %v1315_v14 }
 0xec3   :  { %1316 = vrcp.f32 %v795_v5 }
 0xecd   :  { %v1317_v15 = vpop.eup %1316 }
 0xece   :  { %v808_v21 = vsub.f32 1.0, %v1317_v15  ;;  %v816_v26 = vmul.f32 %v1317_v15, %v814_v20 }
 0xf24   :  { %v799_v1 = vpop.permute.xlu1 %798 }
 0xf25   :  { %v801_v18 = vmul.f32 %v1317_v15, %v799_v1 }
 0xf27   :  { %803 = vrot.lane.b32.xlu0 %v801_v18, %s1434_s15 }
 0xf99   :  { %v804_v0 = vpop.permute.xlu0 %803 }
 0xf9a   :  { %v806_v11 = vadd.f32 %v804_v0, %v1563_v17 }
 0xf9c   :  { %1318 = vtanh.f32 %v806_v11 }
 0xfa6   :  { %v1319_v19 = vpop.eup %1318 }
 0xfa7   :  { %810 = vrot.lane.b32.xlu1 %v1319_v19, %s1435_s3 }
0x1019   :  { %v811_v23 = vpop.permute.xlu1 %810 }
0x101a   :  { %v813_v25 = vmul.f32 %v811_v23, %v808_v21 }
0x101c   :  { %v1654_v27 = vadd.f32 %v816_v26, %v813_v25 }
0x101e   :  { %v823_v28 = vrot.slane %v1654_v27, 2  ;;  %v924_v45 = vrot.slane %v1654_v27, 6 }
0x1020   :  { %824 = vrot.lane.b32.xlu0 %v823_v28, %s1435_s3 }
0x1092   :  { %v825_v29 = vpop.permute.xlu0 %824 }
0x1093   :  { %1207 = vmatmul.mubr.msk.f32.vlgmr.msra.gmra.mrb[6].mxu1 %vm170_vm2, %v825_v29 }
0x1166   :  { %v894_v30 = vpop.f32.mrb[6].mxu1 }
0x1167   :  { %v895_v31 = vadd.f32 %v1561_v16, %v894_v30  ;;  %v1208_v32 = vpop.f32.mrb[7].mxu1 }
0x1169   :  { %v899_v33 = vrot.slane %v895_v31, 4 }
0x116b   :  { %908 = vrot.lane.b32.xlu1 %v899_v33, %s1434_s15  ;;  %v901_v34 = vadd.f32 %v899_v33, %v1563_v17 }
0x116d   :  { %v1078_v35 = vmul.f32 -1.442695, %v901_v34 }
0x116f   :  { %1320 = vpow2.f32 %v1078_v35 }
0x1179   :  { %v1321_v36 = vpop.eup %1320 }
0x117a   :  { %v905_v37 = vadd.f32 1.0, %v1321_v36 }
0x117c   :  { %1322 = vrcp.f32 %v905_v37 }
0x1186   :  { %v1323_v38 = vpop.eup %1322 }
0x1187   :  { %v918_v44 = vsub.f32 1.0, %v1323_v38  ;;  %v926_v48 = vmul.f32 %v1323_v38, %v924_v45 }
0x11dd   :  { %v909_v39 = vpop.permute.xlu1 %908 }
0x11de   :  { %v911_v40 = vmul.f32 %v1323_v38, %v909_v39 }
0x11e0   :  { %913 = vrot.lane.b32.xlu0 %v911_v40, %s1434_s15 }
0x1252   :  { %v914_v41 = vpop.permute.xlu0 %913 }
0x1253   :  { %v916_v42 = vadd.f32 %v914_v41, %v1563_v17 }
0x1255   :  { %1324 = vtanh.f32 %v916_v42 }
0x125f   :  { %v1325_v43 = vpop.eup %1324 }
0x1260   :  { %920 = vrot.lane.b32.xlu1 %v1325_v43, %s1435_s3 }
0x12d2   :  { %v921_v47 = vpop.permute.xlu1 %920 }
0x12d3   :  { %v923_v22 = vmul.f32 %v921_v47, %v918_v44 }
0x12d5   :  { %v927_v49 = vadd.f32 %v926_v48, %v923_v22 }
0x12d7   :  { %v933_v50 = vrot.slane %v927_v49, 4 }
0x12d9   :  { %934 = vrot.lane.b32.xlu0 %v933_v50, %s1435_s3 }
0x134b   :  { %v935_v51 = vpop.permute.xlu0 %934 }
0x134c   :  { %1218 = vmatmul.mubr.msk.f32.vlgmr.msra.gmra.mrb[8].mxu0 %vm170_vm2, %v935_v51 }
0x141f   :  { %v1004_v52 = vpop.f32.mrb[8].mxu0 }
0x1420   :  { %v1005_v53 = vadd.f32 %v1561_v16, %v1004_v52  ;;  %v1219_v54 = vpop.f32.mrb[9].mxu0 }
0x1422   :  { %v1009_v55 = vrot.slane %v1005_v53, 2 }
0x1424   :  { %1018 = vrot.lane.b32.xlu1 %v1009_v55, %s1434_s15  ;;  %v1011_v56 = vadd.f32 %v1009_v55, %v1563_v17 }
0x1426   :  { %v1080_v57 = vmul.f32 -1.442695, %v1011_v56 }
0x1428   :  { %1326 = vpow2.f32 %v1080_v57 }
0x1432   :  { %v1327_v58 = vpop.eup %1326 }
0x1433   :  { %v1015_v60 = vadd.f32 1.0, %v1327_v58 }
0x1435   :  { %1328 = vrcp.f32 %v1015_v60 }
0x143f   :  { %v1329_v61 = vpop.eup %1328 }
0x1496   :  { %v1019_v62 = vpop.permute.xlu1 %1018 }
0x1497   :  { %v1021_v63 = vmul.f32 %v1329_v61, %v1019_v62 }
0x1499   :  { %1023 = vrot.lane.b32.xlu0 %v1021_v63, %s1434_s15 }
0x149d   :  { %382 = vrot.lane.b32.xlu0 %v1588_v59, %s1435_s3 }
0x14a1   :  { %604 = vrot.lane.b32.xlu0 %v1624_v46, %s1435_s3  ;;  %v1034_v46 = vrot.slane %v927_v49, 6 }
0x14a3   :  { %v1036_v8 = vmul.f32 %v1329_v61, %v1034_v46 }
0x14a5   :  { %929 = vrot.lane.b32.xlu0 %v927_v49, %s1435_s3 }
0x150b   :  { %v1024_v16 = vpop.permute.xlu0 %1023 }
0x150c   :  { %v1026_v2 = vadd.f32 %v1024_v16, %v1563_v17  ;;  %v1028_v17 = vsub.f32 1.0, %v1329_v61 }
0x150e   :  { %1330 = vtanh.f32 %v1026_v2 }
0x150f   :  { %v383_v3 = vpop.permute.xlu0 %382 }
0x1510   :  { %386 = vst.msk [vmem:[#allocation8] sm:$0xc] %vm385_vm4, %v383_v3 }
0x1513   :  { %v605_v4 = vpop.permute.xlu0 %604 }
0x1514   :  { %608 = vst.msk [vmem:[#allocation8] sm:$0xc0] %vm607_vm5, %v605_v4 }
0x1517   :  { %v930_v6 = vpop.permute.xlu0 %929 }
0x1518   :  { %v1331_v59 = vpop.eup %1330  ;;  %932 = vst.msk [vmem:[#allocation8 + $0x8] sm:$0x30] %vm496_vm6, %v930_v6 }
0x1519   :  { %1030 = vrot.lane.b32.xlu1 %v1331_v59, %s1435_s3 }
0x151d   :  { %493 = vrot.lane.b32.xlu1 %v1606_v24, %s1435_s3 }
0x1521   :  { %819 = vrot.lane.b32.xlu1 %v1654_v27, %s1435_s3 }
0x158b   :  { %v1031_v7 = vpop.permute.xlu1 %1030 }
0x158c   :  { %v1033_v9 = vmul.f32 %v1031_v7, %v1028_v17 }
0x158e   :  { %v1037_v10 = vadd.f32 %v1036_v8, %v1033_v9 }
0x158f   :  { %v494_v12 = vpop.permute.xlu1 %493 }
0x1590   :  { %497 = vst.msk [vmem:[#allocation8] sm:$0x30] %vm496_vm6, %v494_v12  ;;  %1039 = vrot.lane.b32.xlu1 %v1037_v10, %s1435_s3 }
0x1593   :  { %v820_v13 = vpop.permute.xlu1 %819 }
0x1594   :  { %822 = vst.msk [vmem:[#allocation8 + $0x8] sm:$0xc] %vm385_vm4, %v820_v13 }
0x1602   :  { %v1040_v24 = vpop.permute.xlu1 %1039 }
0x1603   :  { %1042 = vst.msk [vmem:[#allocation8 + $0x8] sm:$0xc0] %vm607_vm5, %v1040_v24 }
0x1604   :  { %1409 = shalt.err (!%p1406_p0)
}
0x1605   :  { %s1410_s2 = scalar_lea.hbm %s1709_s6, 256 }
0x1606   :  { %p1411_p1 = scmp.ne.s32.totalorder %s1709_s6, %s1410_s2  ;;  %p1414_p2 = scmp.lt.u32.totalorder %s1410_s2, %s1709_s6 }
0x1608   :  { %p1416_p3 = pnand %p1414_p2, %p1411_p1 }
0x160a   :  { %1419 = shalt.err (!%p1416_p3)
}
0x160b   :  { %1054 = dma.vmem_to_hbm [thread:$0]  %s1049_s17, 256, %s1709_s6, [#allocation4], %s1428_s9, %s1428_s9, %s1429_s10  }
0x160c   :  { %1424 = dma.done.wait [#allocation4], 256  }
0x160d   :  { %1425 = vsyncadd [#allocation4], 4294967040 }
0x160e   :  { %1058 = vsyncpa [#allocation3], 1 }
0x160f   :  { %1059 = vsyncpa [#allocation6], 1 }
0x1610   :  { %1060 = vsyncpa [#allocation4], 1 }

</bundles_post_ra>
